<compile_context>
chip_gen: v6e
topology: v6e:2x2x1
jax: 0.10.0
libtpu: 0.0.40
codegen_flags: <defaults>
</compile_context>

<pallas_src>
import functools

import jax
import jax.numpy as jnp
from jax import lax
from jax.experimental import pallas as pl
from jax.experimental.pallas import tpu as pltpu


def _round_up(x, m):
    return ((x + m - 1) // m) * m


def _mlp(x, w1, b1, w2, b2, w3, b3):
    """3-layer MLP in f32 on the MXU/VPU (runs inside the kernel)."""
    h = jnp.dot(x, w1, preferred_element_type=jnp.float32) + b1
    h = jnp.maximum(h, 0.0)
    h = jnp.dot(h, w2, preferred_element_type=jnp.float32) + b2
    h = jnp.maximum(h, 0.0)
    return jnp.dot(h, w3, preferred_element_type=jnp.float32) + b3


def ann_kernel_plain(x_ref, w1_ref, b1_ref, w2_ref, b2_ref, w3_ref, b3_ref, o_ref):
    x = x_ref[...].astype(jnp.float32)
    y = _mlp(x, w1_ref[...], b1_ref[...], w2_ref[...], b2_ref[...],
             w3_ref[...], b3_ref[...])
    o_ref[...] = y.astype(o_ref.dtype)


def ann_kernel_degree(x_ref, w1_ref, b1_ref, w2_ref, b2_ref, w3_ref, b3_ref,
                      gin_ref, gout_ref, o_ref, *, degree):
    x = x_ref[...].astype(jnp.float32)
    xx = x * x
    # Per-batch-row sum of squares, broadcast to the packed input / output lane layouts
    # via block-diagonal ones matrices (pure MXU work, no cross-lane shuffles).
    ss_in = jnp.dot(xx, gin_ref[...], preferred_element_type=jnp.float32)
    ss_out = jnp.dot(xx, gout_ref[...], preferred_element_type=jnp.float32)

    inv_norm = lax.rsqrt(ss_in)          # EUP; norm==0 -> inf -> NaN, same as PyTorch x/norm
    y = _mlp(x * inv_norm,
             w1_ref[...], b1_ref[...], w2_ref[...], b2_ref[...],
             w3_ref[...], b3_ref[...])

    # scale = norm ** degree = (sum x^2) ** (degree / 2)
    half = 0.5 * float(degree)
    if half == 1.0:
        scale = ss_out
    elif half == 0.5:
        scale = jnp.sqrt(ss_out)
    elif half == 0.0:
        scale = jnp.ones_like(ss_out)
    else:
        scale = jnp.exp(half * jnp.log(ss_out))   # general degree -> EUP transcendentals

    o_ref[...] = (scale * y).astype(o_ref.dtype)


def ann_forward(x, params, *, degree=None, tile_rows=4096):
    """x: [B, n_in] float32.
    params: dict with transposed weights w1..w3 ([in, out]) and biases b1..b3 ([1, out])."""
    B, n_in = x.shape
    w1, b1 = params["w1"], params["b1"]
    w2, b2 = params["w2"], params["b2"]
    w3, b3 = params["w3"], params["b3"]
    n_out = w3.shape[1]
    f32 = jnp.float32

    # ---- row packing: pack batch rows so the feature (lane) axis is ~128 wide ----
    pack = max(1, 128 // n_in)
    lane_in = pack * n_in
    lane_out = pack * n_out

    eye = jnp.eye(pack, dtype=f32)
    w1b = jnp.kron(eye, w1.astype(f32)); b1b = jnp.tile(b1.astype(f32), (1, pack))
    w2b = jnp.kron(eye, w2.astype(f32)); b2b = jnp.tile(b2.astype(f32), (1, pack))
    w3b = jnp.kron(eye, w3.astype(f32)); b3b = jnp.tile(b3.astype(f32), (1, pack))

    # ---- batch tiling over packed rows (multiple of 8 sublanes, many grid steps) ----
    Bp = _round_up(B, pack) // pack                  # packed rows needed
    tile_p = max(8, tile_rows // pack)               # default ~4096 batch rows / step
    tile_p = _round_up(min(tile_p, _round_up(Bp, 8)), 8)
    Bp_pad = _round_up(Bp, tile_p)
    total_rows = Bp_pad * pack

    xp = x.astype(f32)
    if total_rows != B:
        xp = jnp.concatenate(
            [xp, jnp.zeros((total_rows - B, n_in), f32)], axis=0)
    xp = xp.reshape(Bp_pad, lane_in)                 # free row-major reshape in HBM

    grid = (Bp_pad // tile_p,)

    def resident(arr):
        # small weights / constants: fetched once, stay in VMEM for every grid step
        return pl.BlockSpec(arr.shape, lambda i: (0, 0))

    in_specs = [
        pl.BlockSpec((tile_p, lane_in), lambda i: (i, 0)),   # x tile over (packed) batch
        resident(w1b), resident(b1b),
        resident(w2b), resident(b2b),
        resident(w3b), resident(b3b),
    ]
    args = [xp, w1b, b1b, w2b, b2b, w3b, b3b]

    if degree is None:
        kernel = ann_kernel_plain
    else:
        gin = jnp.kron(eye, jnp.ones((n_in, n_in), f32))
        gout = jnp.kron(eye, jnp.ones((n_in, n_out), f32))
        in_specs += [resident(gin), resident(gout)]
        args += [gin, gout]
        kernel = functools.partial(ann_kernel_degree, degree=degree)

    out = pl.pallas_call(
        kernel,
        out_shape=jax.ShapeDtypeStruct((Bp_pad, lane_out), f32),
        grid_spec=pl.GridSpec(
            grid=grid,
            in_specs=in_specs,
            out_specs=pl.BlockSpec((tile_p, lane_out), lambda i: (i, 0)),
        ),
        compiler_params=pltpu.CompilerParams(
            dimension_semantics=("parallel",)),       # v7x: both TCs take batch tiles
    )(*args)

    # unpack: (Bp_pad, pack*n_out) row-major is exactly (Bp_pad*pack, n_out); drop padding rows
    return out.reshape(Bp_pad * pack, n_out)[:B].astype(x.dtype)


def init_ann_params(key, n_in, n_out, hidden_channels=(24, 24)):
    """Deterministic init mimicking nn.Linear's U(-1/sqrt(fan_in), 1/sqrt(fan_in)).
    Weights stored transposed ([in, out]); biases stored as [1, out]."""
    dims = [n_in, *hidden_channels, n_out]
    params = {}
    for li, (fan_in, fan_out) in enumerate(zip(dims[:-1], dims[1:]), start=1):
        key, kw, kb = jax.random.split(key, 3)
        bound = 1.0 / jnp.sqrt(jnp.float32(fan_in))
        params[f"w{li}"] = jax.random.uniform(
            kw, (fan_in, fan_out), jnp.float32, minval=-bound, maxval=bound)
        params[f"b{li}"] = jax.random.uniform(
            kb, (1, fan_out), jnp.float32, minval=-bound, maxval=bound)
    return params


def ann_reference(x, params, *, degree=None):
    """Pure-JAX reference of the PyTorch forward, for correctness checking."""
    hp = jax.lax.Precision.HIGHEST

    def mlp(z):
        h = jnp.maximum(jnp.dot(z, params["w1"], precision=hp) + params["b1"], 0.0)
        h = jnp.maximum(jnp.dot(h, params["w2"], precision=hp) + params["b2"], 0.0)
        return jnp.dot(h, params["w3"], precision=hp) + params["b3"]

    if degree is None:
        return mlp(x)
    norm = jnp.linalg.norm(x, axis=-1, keepdims=True)
    return norm ** degree * mlp(x / norm)


if __name__ == "__main__":
    key = jax.random.PRNGKey(0)
    k_param, k_x1, k_x2 = jax.random.split(key, 3)

    n_in, n_out = 16, 4
    hidden = (24, 24)

    params = init_ann_params(k_param, n_in, n_out, hidden)

    # small batch, NOT a multiple of the pack factor -> exercises padding / unpack path
    x_small = jax.random.normal(k_x1, (200, n_in), jnp.float32)
    # larger batch -> multi-step grid (pipelined, megacore-shardable on v7x)
    x_big = jax.random.normal(k_x2, (16384, n_in), jnp.float32)

    cases = [
        ("small/degree=None", x_small, None, 1e-4),
        ("small/degree=2",    x_small, 2,    1e-3),
        ("big/degree=None",   x_big,   None, 1e-4),
        ("big/degree=2",      x_big,   2,    1e-3),
    ]
    for name, x, deg, tol in cases:
        y = ann_forward(x, params, degree=deg)
        jax.block_until_ready(y)
        y_ref = ann_reference(x, params, degree=deg)
        assert y.shape == y_ref.shape, f"{name}: shape mismatch {y.shape} vs {y_ref.shape}"
        assert jnp.allclose(y, y_ref, atol=tol, rtol=tol), f"{name}: value mismatch"

    print("KERNEL_OK")
</pallas_src>

<mosaic_0001>
module attributes {stable_mosaic.version = 11 : i64} {
  func.func @ann_kernel_plain(%arg0: i32, %arg1: memref<32x128xf32, #tpu.memory_space<vmem>>, %arg2: memref<128x192xf32, #tpu.memory_space<vmem>>, %arg3: memref<1x192xf32, #tpu.memory_space<vmem>>, %arg4: memref<192x192xf32, #tpu.memory_space<vmem>>, %arg5: memref<1x192xf32, #tpu.memory_space<vmem>>, %arg6: memref<192x32xf32, #tpu.memory_space<vmem>>, %arg7: memref<1x32xf32, #tpu.memory_space<vmem>>, %arg8: memref<32x32xf32, #tpu.memory_space<vmem>>) attributes {dimension_semantics = [#tpu.dimension_semantics<parallel>], iteration_bounds = array<i64: 1>, scalar_prefetch = 0 : i64, scratch_operands = 0 : i64, tpu.core_type = #tpu.core_type<tc>, window_params = [{transform_indices = @transform_0, window_bounds = array<i64: 32, 128>}, {pipeline_mode = #tpu.pipeline_mode<synchronous>, transform_indices = @transform_1, window_bounds = array<i64: 128, 192>}, {pipeline_mode = #tpu.pipeline_mode<synchronous>, transform_indices = @transform_2, window_bounds = array<i64: 1, 192>}, {pipeline_mode = #tpu.pipeline_mode<synchronous>, transform_indices = @transform_3, window_bounds = array<i64: 192, 192>}, {pipeline_mode = #tpu.pipeline_mode<synchronous>, transform_indices = @transform_4, window_bounds = array<i64: 1, 192>}, {pipeline_mode = #tpu.pipeline_mode<synchronous>, transform_indices = @transform_5, window_bounds = array<i64: 192, 32>}, {pipeline_mode = #tpu.pipeline_mode<synchronous>, transform_indices = @transform_6, window_bounds = array<i64: 1, 32>}, {transform_indices = @transform_7, window_bounds = array<i64: 32, 32>}]} {
    %c0 = arith.constant 0 : index
    %c0_0 = arith.constant 0 : index
    %0 = vector.load %arg1[%c0, %c0_0] : memref<32x128xf32, #tpu.memory_space<vmem>>, vector<32x128xf32>
    %c0_1 = arith.constant 0 : index
    %c0_2 = arith.constant 0 : index
    %1 = vector.load %arg2[%c0_1, %c0_2] : memref<128x192xf32, #tpu.memory_space<vmem>>, vector<128x192xf32>
    %c0_3 = arith.constant 0 : index
    %c0_4 = arith.constant 0 : index
    %2 = vector.load %arg3[%c0_3, %c0_4] : memref<1x192xf32, #tpu.memory_space<vmem>>, vector<1x192xf32>
    %c0_5 = arith.constant 0 : index
    %c0_6 = arith.constant 0 : index
    %3 = vector.load %arg4[%c0_5, %c0_6] : memref<192x192xf32, #tpu.memory_space<vmem>>, vector<192x192xf32>
    %c0_7 = arith.constant 0 : index
    %c0_8 = arith.constant 0 : index
    %4 = vector.load %arg5[%c0_7, %c0_8] : memref<1x192xf32, #tpu.memory_space<vmem>>, vector<1x192xf32>
    %c0_9 = arith.constant 0 : index
    %c0_10 = arith.constant 0 : index
    %5 = vector.load %arg6[%c0_9, %c0_10] : memref<192x32xf32, #tpu.memory_space<vmem>>, vector<192x32xf32>
    %c0_11 = arith.constant 0 : index
    %c0_12 = arith.constant 0 : index
    %6 = vector.load %arg7[%c0_11, %c0_12] : memref<1x32xf32, #tpu.memory_space<vmem>>, vector<1x32xf32>
    %cst = arith.constant dense<0.000000e+00> : vector<32x192xf32>
    %7 = tpu.matmul %0, %1, %cst {dimension_numbers = #tpu.dot_dimension_numbers<[1], [0], [0], [1], [0, 0, 1, 1], [], []>} : vector<32x128xf32>, vector<128x192xf32>, vector<32x192xf32> -> vector<32x192xf32>
    %8 = vector.broadcast %2 : vector<1x192xf32> to vector<32x192xf32>
    %9 = arith.addf %7, %8 : vector<32x192xf32>
    %cst_13 = arith.constant 0.000000e+00 : f32
    %10 = vector.broadcast %cst_13 : f32 to vector<32x192xf32>
    %11 = arith.maximumf %9, %10 : vector<32x192xf32>
    %cst_14 = arith.constant dense<0.000000e+00> : vector<32x192xf32>
    %12 = tpu.matmul %11, %3, %cst_14 {dimension_numbers = #tpu.dot_dimension_numbers<[1], [0], [0], [1], [0, 0, 1, 1], [], []>} : vector<32x192xf32>, vector<192x192xf32>, vector<32x192xf32> -> vector<32x192xf32>
    %13 = vector.broadcast %4 : vector<1x192xf32> to vector<32x192xf32>
    %14 = arith.addf %12, %13 : vector<32x192xf32>
    %cst_15 = arith.constant 0.000000e+00 : f32
    %15 = vector.broadcast %cst_15 : f32 to vector<32x192xf32>
    %16 = arith.maximumf %14, %15 : vector<32x192xf32>
    %cst_16 = arith.constant dense<0.000000e+00> : vector<32x32xf32>
    %17 = tpu.matmul %16, %5, %cst_16 {dimension_numbers = #tpu.dot_dimension_numbers<[1], [0], [0], [1], [0, 0, 1, 1], [], []>} : vector<32x192xf32>, vector<192x32xf32>, vector<32x32xf32> -> vector<32x32xf32>
    %18 = vector.broadcast %6 : vector<1x32xf32> to vector<32x32xf32>
    %19 = arith.addf %17, %18 : vector<32x32xf32>
    %c0_17 = arith.constant 0 : index
    %c0_18 = arith.constant 0 : index
    %20 = vector.load %arg8[%c0_17, %c0_18] : memref<32x32xf32, #tpu.memory_space<vmem>>, vector<32x32xf32>
    tpu.vector_store %arg8[%c0_17, %c0_18], %19 {strides = array<i32>} : memref<32x32xf32, #tpu.memory_space<vmem>>, vector<32x32xf32>,
    return
  }
  func.func @transform_0(%arg0: i32) -> (i32, i32) {
    %c0_i32 = arith.constant 0 : i32
    %c0_i32_0 = arith.constant 0 : i32
    return %arg0, %c0_i32 : i32, i32
  }
  func.func @transform_1(%arg0: i32) -> (i32, i32) {
    %c0_i32 = arith.constant 0 : i32
    %c0_i32_0 = arith.constant 0 : i32
    %c0_i32_1 = arith.constant 0 : i32
    return %c0_i32, %c0_i32_0 : i32, i32
  }
  func.func @transform_2(%arg0: i32) -> (i32, i32) {
    %c0_i32 = arith.constant 0 : i32
    %c0_i32_0 = arith.constant 0 : i32
    %c0_i32_1 = arith.constant 0 : i32
    return %c0_i32, %c0_i32_0 : i32, i32
  }
  func.func @transform_3(%arg0: i32) -> (i32, i32) {
    %c0_i32 = arith.constant 0 : i32
    %c0_i32_0 = arith.constant 0 : i32
    %c0_i32_1 = arith.constant 0 : i32
    return %c0_i32, %c0_i32_0 : i32, i32
  }
  func.func @transform_4(%arg0: i32) -> (i32, i32) {
    %c0_i32 = arith.constant 0 : i32
    %c0_i32_0 = arith.constant 0 : i32
    %c0_i32_1 = arith.constant 0 : i32
    return %c0_i32, %c0_i32_0 : i32, i32
  }
  func.func @transform_5(%arg0: i32) -> (i32, i32) {
    %c0_i32 = arith.constant 0 : i32
    %c0_i32_0 = arith.constant 0 : i32
    %c0_i32_1 = arith.constant 0 : i32
    return %c0_i32, %c0_i32_0 : i32, i32
  }
  func.func @transform_6(%arg0: i32) -> (i32, i32) {
    %c0_i32 = arith.constant 0 : i32
    %c0_i32_0 = arith.constant 0 : i32
    %c0_i32_1 = arith.constant 0 : i32
    return %c0_i32, %c0_i32_0 : i32, i32
  }
  func.func @transform_7(%arg0: i32) -> (i32, i32) {
    %c0_i32 = arith.constant 0 : i32
    %c0_i32_0 = arith.constant 0 : i32
    return %arg0, %c0_i32 : i32, i32
  }
}

</mosaic_0001>

<bundles_post_ra>
// kernel: tpu_custom_call.1
= control target key start
LH: loop header
LB: loop body
LE: loop exit
PB: predicated region body
PF: predicated region fallthrough
CT: control target
= control target key end

     0   :  { %v526_v4 = vmov 0.0   ;;  %s946_s0 = inlined_call_operand.vmem [shape: f32[32,128], index: 0, kind: input, shape index: {}]   ;;  %s947_s1 = inlined_call_operand.vmem [shape: f32[128,192], index: 1, kind: input, shape index: {}]   ;;  %s948_s2 = inlined_call_operand.vmem [shape: f32[1,192], index: 2, kind: input, shape index: {}]   ;;  %s949_s3 = inlined_call_operand.vmem [shape: f32[192,192], index: 3, kind: input, shape index: {}]   ;;  %s950_s4 = inlined_call_operand.vmem [shape: f32[1,192], index: 4, kind: input, shape index: {}]   ;;  %s951_s5 = inlined_call_operand.vmem [shape: f32[192,32], index: 5, kind: input, shape index: {}]   ;;  %s952_s6 = inlined_call_operand.vmem [shape: f32[1,32], index: 6, kind: input, shape index: {}]   ;;  %s953_s7 = inlined_call_operand.hbm [shape: f32[32,32], index: 7, kind: output, shape index: {}]  }
   0x1   :  { %v62_v0 = vld [vmem:[%s947_s1 + $0xf8] sm:$0xff]  ;;  %v61_v1 = vld [vmem:[%s947_s1 + $0xf0] sm:$0xff]  ;;  %v60_v2 = vld [vmem:[%s947_s1 + $0xe8] sm:$0xff]  ;;  %213 = vmatprep.mubr.f32.mxu0 %v526_v4 }
   0x2   :  { %149 = vmatprep.subr.mxu0 %v62_v0  ;;  %v59_v3 = vld [vmem:[%s947_s1 + $0xe0] sm:$0xff]  ;;  %v58_v5 = vld [vmem:[%s947_s1 + $0xd8] sm:$0xff]  ;;  %v57_v6 = vld [vmem:[%s947_s1 + $0xd0] sm:$0xff] }
   0x3   :  { %150 = vmatpush1.msra.mxu0 %v61_v1  ;;  %v56_v7 = vld [vmem:[%s947_s1 + $0xc8] sm:$0xff]  ;;  %v55_v8 = vld [vmem:[%s947_s1 + $0xc0] sm:$0xff]  ;;  %v54_v9 = vld [vmem:[%s947_s1 + $0xb8] sm:$0xff] }
   0x4   :  { %151 = vmatprep.subr.mxu0 %v60_v2  ;;  %v53_v10 = vld [vmem:[%s947_s1 + $0xb0] sm:$0xff]  ;;  %v52_v11 = vld [vmem:[%s947_s1 + $0xa8] sm:$0xff]  ;;  %v51_v12 = vld [vmem:[%s947_s1 + $0xa0] sm:$0xff] }
   0x5   :  { %152 = vmatpush1.msra.mxu0 %v59_v3  ;;  %v50_v13 = vld [vmem:[%s947_s1 + $0x98] sm:$0xff]  ;;  %v49_v14 = vld [vmem:[%s947_s1 + $0x90] sm:$0xff]  ;;  %v48_v15 = vld [vmem:[%s947_s1 + $0x88] sm:$0xff] }
   0x6   :  { %153 = vmatprep.subr.mxu0 %v58_v5  ;;  %v95_v16 = vld [vmem:[%s949_s3 + $0xf8] sm:$0xff]  ;;  %v94_v17 = vld [vmem:[%s949_s3 + $0xf0] sm:$0xff]  ;;  %v93_v18 = vld [vmem:[%s949_s3 + $0xe8] sm:$0xff] }
   0x7   :  { %154 = vmatpush1.msra.mxu0 %v57_v6  ;;  %v47_v19 = vld [vmem:[%s947_s1 + $0x80] sm:$0xff]  ;;  %270 = vmatprep.subr.mxu1 %v95_v16  ;;  %v46_v21 = vld [vmem:[%s947_s1 + $0x78] sm:$0xff]  ;;  %v45_v23 = vld [vmem:[%s947_s1 + $0x70] sm:$0xff] }
   0x8   :  { %155 = vmatprep.subr.mxu0 %v56_v7  ;;  %v92_v20 = vld [vmem:[%s949_s3 + $0xe0] sm:$0xff]  ;;  %271 = vmatpush1.msra.mxu1 %v94_v17  ;;  %v91_v22 = vld [vmem:[%s949_s3 + $0xd8] sm:$0xff]  ;;  %v90_v24 = vld [vmem:[%s949_s3 + $0xd0] sm:$0xff] }
   0x9   :  { %156 = vmatpush1.msra.mxu0 %v55_v8  ;;  %272 = vmatprep.subr.mxu1 %v93_v18  ;;  %v44_v25 = vld [vmem:[%s947_s1 + $0x68] sm:$0xff]  ;;  %v43_v27 = vld [vmem:[%s947_s1 + $0x60] sm:$0xff]  ;;  %v42_v29 = vld [vmem:[%s947_s1 + $0x58] sm:$0xff] }
   0xa   :  { %157 = vmatprep.subr.mxu0 %v54_v9  ;;  %273 = vmatpush1.msra.mxu1 %v92_v20  ;;  %v89_v26 = vld [vmem:[%s949_s3 + $0xc8] sm:$0xff]  ;;  %v88_v28 = vld [vmem:[%s949_s3 + $0xc0] sm:$0xff]  ;;  %v87_v30 = vld [vmem:[%s949_s3 + $0xb8] sm:$0xff] }
   0xb   :  { %158 = vmatpush1.msra.mxu0 %v53_v10  ;;  %274 = vmatprep.subr.mxu1 %v91_v22  ;;  %v41_v31 = vld [vmem:[%s947_s1 + $0x50] sm:$0xff]  ;;  %v40_v33 = vld [vmem:[%s947_s1 + $0x48] sm:$0xff]  ;;  %v39_v35 = vld [vmem:[%s947_s1 + $0x40] sm:$0xff] }
   0xc   :  { %159 = vmatprep.subr.mxu0 %v52_v11  ;;  %275 = vmatpush1.msra.mxu1 %v90_v24  ;;  %v86_v32 = vld [vmem:[%s949_s3 + $0xb0] sm:$0xff]  ;;  %v85_v34 = vld [vmem:[%s949_s3 + $0xa8] sm:$0xff]  ;;  %v84_v36 = vld [vmem:[%s949_s3 + $0xa0] sm:$0xff] }
   0xd   :  { %160 = vmatpush1.msra.mxu0 %v51_v12  ;;  %276 = vmatprep.subr.mxu1 %v89_v26  ;;  %v38_v37 = vld [vmem:[%s947_s1 + $0x38] sm:$0xff]  ;;  %v37_v39 = vld [vmem:[%s947_s1 + $0x30] sm:$0xff]  ;;  %v36_v41 = vld [vmem:[%s947_s1 + $0x28] sm:$0xff] }
   0xe   :  { %161 = vmatprep.subr.mxu0 %v50_v13  ;;  %277 = vmatpush1.msra.mxu1 %v88_v28  ;;  %v83_v38 = vld [vmem:[%s949_s3 + $0x98] sm:$0xff]  ;;  %v82_v40 = vld [vmem:[%s949_s3 + $0x90] sm:$0xff]  ;;  %v81_v42 = vld [vmem:[%s949_s3 + $0x88] sm:$0xff] }
   0xf   :  { %162 = vmatpush1.msra.mxu0 %v49_v14  ;;  %278 = vmatprep.subr.mxu1 %v87_v30  ;;  %v35_v43 = vld [vmem:[%s947_s1 + $0x20] sm:$0xff] }
  0x10   :  { %163 = vmatprep.subr.mxu0 %v48_v15  ;;  %279 = vmatpush1.msra.mxu1 %v86_v32  ;;  %v80_v44 = vld [vmem:[%s949_s3 + $0x80] sm:$0xff] }
  0x11   :  { %164 = vmatpush1.msra.mxu0 %v47_v19  ;;  %280 = vmatprep.subr.mxu1 %v85_v34 }
  0x12   :  { %165 = vmatprep.subr.mxu0 %v46_v21  ;;  %281 = vmatpush1.msra.mxu1 %v84_v36 }
  0x13   :  { %166 = vmatpush1.msra.mxu0 %v45_v23  ;;  %282 = vmatprep.subr.mxu1 %v83_v38 }
  0x14   :  { %167 = vmatprep.subr.mxu0 %v44_v25 }
  0x15   :  { %168 = vmatpush1.msra.mxu0 %v43_v27 }
  0x16   :  { %169 = vmatprep.subr.mxu0 %v42_v29 }
  0x17   :  { %170 = vmatpush1.msra.mxu0 %v41_v31 }
  0x18   :  { %171 = vmatprep.subr.mxu0 %v40_v33 }
  0x19   :  { %172 = vmatpush1.msra.mxu0 %v39_v35 }
  0x1a   :  { %173 = vmatprep.subr.mxu0 %v38_v37 }
  0x1b   :  { %12 = vsyncpa [#allocation3], 0  ;;  %174 = vmatpush1.msra.mxu0 %v37_v39  ;;  %v34_v45 = vld [vmem:[%s947_s1 + $0x18] sm:$0xff]  ;;  %283 = vmatpush1.msra.mxu1 %v82_v40  ;;  %v33_v47 = vld [vmem:[%s947_s1 + $0x10] sm:$0xff]  ;;  %vm257_vm0 = vcmask 523264   ;;  %vm470_vm1 = vcmask 261120  }
  0x1c   :  { %v79_v46 = vld [vmem:[%s949_s3 + $0x78] sm:$0xff]  ;;  %175 = vmatprep.subr.mxu0 %v36_v41  ;;  %284 = vmatprep.subr.mxu1 %v81_v42  ;;  %v78_v48 = vld [vmem:[%s949_s3 + $0x70] sm:$0xff]  ;;  %v32_v49 = vld [vmem:[%s947_s1 + $0x8] sm:$0xff]  ;;  %v139_v42 = vlaneseq  ;;  %s527_s26 = smov [#allocation2]  }
  0x1d   :  { %176 = vmatpush1.msra.mxu0 %v35_v43  ;;  %285 = vmatpush1.msra.mxu1 %v80_v44  ;;  %v77_v50 = vld [vmem:[%s949_s3 + $0x68] sm:$0xff]  ;;  %v31_v51 = vld [vmem:[%s947_s1] sm:$0xff]  ;;  %v75_v54 = vld [vmem:[%s949_s3 + $0x58] sm:$0xff]  ;;  %s480_s27 = sshll.u32 %s527_s26, 4  ;;  %s481_s27 = int_to_ptr.vmem [resolvable:$true] %s480_s27 }
  0x1e   :  { %177 = vmatprep.subr.mxu0 %v34_v45  ;;  %286 = vmatprep.subr.mxu1 %v79_v46  ;;  %v76_v52 = vld [vmem:[%s949_s3 + $0x60] sm:$0xff]  ;;  %v74_v55 = vld [vmem:[%s949_s3 + $0x50] sm:$0xff]  ;;  %v73_v56 = vld [vmem:[%s949_s3 + $0x48] sm:$0xff]  ;;  %v140_v43 = vshrl.u32 %v139_v42, 7  ;;  %p509_p1 = scmp.lt.s32.totalorder %s481_s27, %s481_s27 }
  0x1f   :  { %178 = vmatpush1.msra.mxu0 %v33_v47  ;;  %v27_v53 = vld [vmem:[%s946_s0] sm:$0xff]  ;;  %287 = vmatpush1.msra.mxu1 %v78_v48  ;;  %v28_v58 = vld [vmem:[%s946_s0 + $0x8] sm:$0xff]  ;;  %v71_v59 = vld [vmem:[%s949_s3 + $0x38] sm:$0xff] }
  0x20   :  { %179 = vmatprep.subr.mxu0 %v32_v49  ;;  %288 = vmatprep.subr.mxu1 %v77_v50  ;;  %v72_v57 = vld [vmem:[%s949_s3 + $0x40] sm:$0xff]  ;;  %v70_v60 = vld [vmem:[%s949_s3 + $0x30] sm:$0xff]  ;;  %v69_v61 = vld [vmem:[%s949_s3 + $0x28] sm:$0xff]  ;;  %v141_v44 = vsub.s32 0, %v140_v43  ;;  %v145_v46 = vsub.s32 1, %v140_v43 }
  0x21   :  { %180 = vmatpush1.msra.mxu0 %v31_v51  ;;  %289 = vmatpush1.msra.mxu1 %v76_v52  ;;  %v68_v62 = vld [vmem:[%s949_s3 + $0x20] sm:$0xff]  ;;  %v29_v63 = vld [vmem:[%s946_s0 + $0x10] sm:$0xff]  ;;  %v67_v0 = vld [vmem:[%s949_s3 + $0x18] sm:$0xff] }
  0x22   :  { %214 = vmatmul.mubr.f32.vlgmr.msra.gmra.mxu0 %v27_v53  ;;  %290 = vmatprep.subr.mxu1 %v75_v54  ;;  %v66_v1 = vld [vmem:[%s949_s3 + $0x10] sm:$0xff]  ;;  %v65_v2 = vld [vmem:[%s949_s3 + $0x8] sm:$0xff]  ;;  %v64_v3 = vld [vmem:[%s949_s3] sm:$0xff] }
  0x23   :  { %219 = vmatprep.mubr.f32.mxu0 %v526_v4  ;;  %291 = vmatpush1.msra.mxu1 %v74_v55  ;;  %v30_v5 = vld [vmem:[%s946_s0 + $0x18] sm:$0xff]  ;;  %v110_v7 = vld [vmem:[%s949_s3 + $0x170] sm:$0xff]  ;;  %v109_v8 = vld [vmem:[%s949_s3 + $0x168] sm:$0xff] }
  0x24   :  { %292 = vmatprep.subr.mxu1 %v73_v56  ;;  %385 = vmatprep.subr.mxu0 %v526_v4  ;;  %v111_v6 = vld [vmem:[%s949_s3 + $0x178] sm:$0xff]  ;;  %v108_v9 = vld [vmem:[%s949_s3 + $0x160] sm:$0xff]  ;;  %v106_v11 = vld [vmem:[%s949_s3 + $0x150] sm:$0xff] }
  0x25   :  { %293 = vmatpush1.msra.mxu1 %v72_v57  ;;  %v107_v10 = vld [vmem:[%s949_s3 + $0x158] sm:$0xff]  ;;  %v105_v12 = vld [vmem:[%s949_s3 + $0x148] sm:$0xff]  ;;  %v104_v13 = vld [vmem:[%s949_s3 + $0x140] sm:$0xff] }
  0x26   :  { %220 = vmatmul.mubr.f32.gmra.mxu0 %v28_v58  ;;  %294 = vmatprep.subr.mxu1 %v71_v59  ;;  %v103_v14 = vld [vmem:[%s949_s3 + $0x138] sm:$0xff]  ;;  %v102_v15 = vld [vmem:[%s949_s3 + $0x130] sm:$0xff]  ;;  %v101_v16 = vld [vmem:[%s949_s3 + $0x128] sm:$0xff] }
  0x27   :  { %225 = vmatprep.mubr.f32.mxu0 %v526_v4  ;;  %295 = vmatpush1.msra.mxu1 %v70_v60  ;;  %v100_v17 = vld [vmem:[%s949_s3 + $0x120] sm:$0xff]  ;;  %v99_v18 = vld [vmem:[%s949_s3 + $0x118] sm:$0xff]  ;;  %v98_v19 = vld [vmem:[%s949_s3 + $0x110] sm:$0xff] }
  0x28   :  { %296 = vmatprep.subr.mxu1 %v69_v61  ;;  %v97_v20 = vld [vmem:[%s949_s3 + $0x108] sm:$0xff]  ;;  %v96_v21 = vld [vmem:[%s949_s3 + $0x100] sm:$0xff]  ;;  %v128_v22 = vld [vmem:[%s951_s5 + $0x78] sm:$0xff] }
  0x29   :  { %297 = vmatpush1.msra.mxu1 %v68_v62  ;;  %v127_v23 = vld [vmem:[%s951_s5 + $0x70] sm:$0xff]  ;;  %386 = vmatpush1.msra.mxu0 %v128_v22  ;;  %v126_v24 = vld [vmem:[%s951_s5 + $0x68] sm:$0xff]  ;;  %v125_v25 = vld [vmem:[%s951_s5 + $0x60] sm:$0xff] }
  0x2a   :  { %226 = vmatmul.mubr.f32.gmra.mxu0 %v29_v63  ;;  %298 = vmatprep.subr.mxu1 %v67_v0  ;;  %v124_v26 = vld [vmem:[%s951_s5 + $0x58] sm:$0xff]  ;;  %v123_v27 = vld [vmem:[%s951_s5 + $0x50] sm:$0xff]  ;;  %v122_v28 = vld [vmem:[%s951_s5 + $0x48] sm:$0xff] }
  0x2b   :  { %231 = vmatprep.mubr.f32.mxu0 %v526_v4  ;;  %299 = vmatpush1.msra.mxu1 %v66_v1  ;;  %v121_v29 = vld [vmem:[%s951_s5 + $0x40] sm:$0xff]  ;;  %v120_v30 = vld [vmem:[%s951_s5 + $0x38] sm:$0xff]  ;;  %v119_v31 = vld [vmem:[%s951_s5 + $0x30] sm:$0xff] }
  0x2c   :  { %300 = vmatprep.subr.mxu1 %v65_v2  ;;  %387 = vmatprep.subr.mxu0 %v526_v4  ;;  %v118_v32 = vld [vmem:[%s951_s5 + $0x28] sm:$0xff]  ;;  %v117_v33 = vld [vmem:[%s951_s5 + $0x20] sm:$0xff]  ;;  %v116_v34 = vld [vmem:[%s951_s5 + $0x18] sm:$0xff] }
  0x2d   :  { %301 = vmatpush1.msra.mxu1 %v64_v3  ;;  %388 = vmatpush1.msra.mxu0 %v127_v23  ;;  %v115_v35 = vld [vmem:[%s951_s5 + $0x10] sm:$0xff]  ;;  %v114_v36 = vld [vmem:[%s951_s5 + $0x8] sm:$0xff]  ;;  %v113_v37 = vld [vmem:[%s951_s5] sm:$0xff] }
  0x2e   :  { %232 = vmatmul.mubr.f32.gmra.mxu0 %v30_v5  ;;  %318 = vmatprep.subr.mxu1 %v111_v6  ;;  %v136_v38 = vld [vmem:[%s951_s5 + $0xb8] sm:$0xff]  ;;  %v135_v39 = vld [vmem:[%s951_s5 + $0xb0] sm:$0xff]  ;;  %v134_v40 = vld [vmem:[%s951_s5 + $0xa8] sm:$0xff] }
  0x2f   :  { %319 = vmatpush2.msra.mxu1 %v110_v7  ;;  %389 = vmatprep.subr.mxu0 %v526_v4  ;;  %v133_v41 = vld [vmem:[%s951_s5 + $0xa0] sm:$0xff] }
  0x30   :  { %320 = vmatprep.subr.mxu1 %v109_v8  ;;  %390 = vmatpush1.msra.mxu0 %v126_v24  ;;  %v63_v45 = vld [vmem:[%s948_s2] sm:$0x3] }
  0x31   :  { %321 = vmatpush2.msra.mxu1 %v108_v9  ;;  %391 = vmatprep.subr.mxu0 %v526_v4  ;;  %v142_v47 = vrot.slane %v63_v45, %v141_v44  ;;  %v146_v48 = vrot.slane %v63_v45, %v145_v46 }
  0x32   :  { %322 = vmatprep.subr.mxu1 %v107_v10  ;;  %392 = vmatpush1.msra.mxu0 %v125_v25  ;;  %v132_v10 = vld [vmem:[%s951_s5 + $0x98] sm:$0xff] }
  0x33   :  { %323 = vmatpush2.msra.mxu1 %v106_v11  ;;  %393 = vmatprep.subr.mxu0 %v526_v4  ;;  %v131_v11 = vld [vmem:[%s951_s5 + $0x90] sm:$0xff] }
  0x34   :  { %324 = vmatprep.subr.mxu1 %v105_v12  ;;  %394 = vmatpush1.msra.mxu0 %v124_v26  ;;  %v130_v12 = vld [vmem:[%s951_s5 + $0x88] sm:$0xff] }
  0x35   :  { %325 = vmatpush2.msra.mxu1 %v104_v13  ;;  %395 = vmatprep.subr.mxu0 %v526_v4  ;;  %v129_v13 = vld [vmem:[%s951_s5 + $0x80] sm:$0xff] }
  0x36   :  { %326 = vmatprep.subr.mxu1 %v103_v14  ;;  %396 = vmatpush1.msra.mxu0 %v123_v27  ;;  %v112_v14 = vld [vmem:[%s950_s4] sm:$0x3] }
  0x37   :  { %327 = vmatpush2.msra.mxu1 %v102_v15  ;;  %397 = vmatprep.subr.mxu0 %v526_v4  ;;  %v250_v15 = vrot.slane %v112_v14, %v141_v44 }
  0x38   :  { %328 = vmatprep.subr.mxu1 %v101_v16  ;;  %398 = vmatpush1.msra.mxu0 %v122_v28  ;;  %v254_v16 = vrot.slane %v112_v14, %v145_v46 }
  0x39   :  { %329 = vmatpush2.msra.mxu1 %v100_v17  ;;  %399 = vmatprep.subr.mxu0 %v526_v4 }
  0x3a   :  { %330 = vmatprep.subr.mxu1 %v99_v18  ;;  %400 = vmatpush1.msra.mxu0 %v121_v29 }
  0x3b   :  { %331 = vmatpush2.msra.mxu1 %v98_v19  ;;  %401 = vmatprep.subr.mxu0 %v526_v4 }
  0x3c   :  { %332 = vmatprep.subr.mxu1 %v97_v20  ;;  %402 = vmatpush1.msra.mxu0 %v120_v30 }
  0x3d   :  { %333 = vmatpush2.msra.mxu1 %v96_v21  ;;  %403 = vmatprep.subr.mxu0 %v526_v4 }
  0x3e   :  { %404 = vmatpush1.msra.mxu0 %v119_v31 }
  0x3f   :  { %405 = vmatprep.subr.mxu0 %v526_v4 }
  0x40   :  { %406 = vmatpush1.msra.mxu0 %v118_v32 }
  0x41   :  { %407 = vmatprep.subr.mxu0 %v526_v4 }
  0x42   :  { %408 = vmatpush1.msra.mxu0 %v117_v33 }
  0x43   :  { %409 = vmatprep.subr.mxu0 %v526_v4 }
  0x44   :  { %410 = vmatpush1.msra.mxu0 %v116_v34 }
  0x45   :  { %411 = vmatprep.subr.mxu0 %v526_v4 }
  0x46   :  { %412 = vmatpush1.msra.mxu0 %v115_v35 }
  0x47   :  { %413 = vmatprep.subr.mxu0 %v526_v4 }
  0x48   :  { %414 = vmatpush1.msra.mxu0 %v114_v36 }
  0x49   :  { %415 = vmatprep.subr.mxu0 %v526_v4 }
  0x4a   :  { %416 = vmatpush1.msra.mxu0 %v113_v37 }
  0x4b   :  { %433 = vmatprep.subr.mxu0 %v526_v4 }
  0x4c   :  { %434 = vmatpush2.msra.mxu0 %v136_v38 }
  0x4d   :  { %435 = vmatprep.subr.mxu0 %v526_v4 }
  0x4e   :  { %436 = vmatpush2.msra.mxu0 %v135_v39 }
  0x4f   :  { %437 = vmatprep.subr.mxu0 %v526_v4 }
  0x50   :  { %438 = vmatpush2.msra.mxu0 %v134_v40  ;;  %v495_v40 = vld [vmem:[%s952_s6] ss:$0 sm:$0xff]  ;;  %s504_s6 = scalar_lea.vmem %s481_s27, 512 }
  0x51   :  { %439 = vmatprep.subr.mxu0 %v526_v4  ;;  %p505_p0 = scmp.ne.s32.totalorder %s481_s27, %s504_s6  ;;  %p510_p2 = scmp.lt.s32.totalorder %s504_s6, %s504_s6 }
  0x52   :  { %440 = vmatpush2.msra.mxu0 %v133_v41 }
  0x53   :  { %441 = vmatprep.subr.mxu0 %v526_v4  ;;  %p511_p3 = por %p510_p2, %p509_p1 }
  0x54   :  { %442 = vmatpush2.msra.mxu0 %v132_v10 }
  0x55   :  { %443 = vmatprep.subr.mxu0 %v526_v4  ;;  %p512_p4 = pnand %p511_p3, %p505_p0 }
  0x56   :  { %444 = vmatpush2.msra.mxu0 %v131_v11 }
  0x57   :  { %445 = vmatprep.subr.mxu0 %v526_v4 }
  0x58   :  { %446 = vmatpush2.msra.mxu0 %v130_v12 }
  0x59   :  { %447 = vmatprep.subr.mxu0 %v526_v4 }
  0x5a   :  { %448 = vmatpush2.msra.mxu0 %v129_v13 }
  0xe2   :  { %v215_v49 = vpop.f32.mrf.mxu0 }
  0xe3   :  { %v216_v50 = vadd.f32 %v215_v49, %v142_v47 }
  0xe4   :  { %v217_v51 = vpop.f32.mrf.mxu0 }
  0xe5   :  { %v218_v52 = vadd.f32 %v217_v51, %v146_v48  ;;  %v238_v55 = vmax.f32 %v216_v50, 0.0 }
  0xe6   :  { %v221_v53 = vpop.f32.mrf.mxu0 }
  0xe7   :  { %v239_v54 = vmax.f32 %v218_v52, 0.0  ;;  %v222_v56 = vadd.f32 %v221_v53, %v142_v47 }
  0xe8   :  { %v223_v57 = vpop.f32.mrf.mxu0 }
  0xe9   :  { %v224_v58 = vadd.f32 %v223_v57, %v146_v48  ;;  %491 = vmatprep.mubr.msk.f32.mxu1 %vm257_vm0, %v239_v54  ;;  %v240_v61 = vmax.f32 %v222_v56, 0.0 }
  0xea   :  { %v227_v59 = vpop.f32.mrf.mxu0  ;;  %335 = vmatmul.mubr.f32.vlgmr.msra.gmra.mxu1 %v238_v55 }
  0xeb   :  { %v241_v60 = vmax.f32 %v224_v58, 0.0  ;;  %v228_v62 = vadd.f32 %v227_v59, %v142_v47 }
  0xec   :  { %v229_v63 = vpop.f32.mrf.mxu0 }
  0xed   :  { %v230_v0 = vadd.f32 %v229_v63, %v146_v48  ;;  %492 = vmatprep.mubr.msk.f32.mxu1 %vm257_vm0, %v241_v60  ;;  %v242_v3 = vmax.f32 %v228_v62, 0.0 }
  0xee   :  { %v233_v1 = vpop.f32.mrf.mxu0  ;;  %341 = vmatmul.mubr.f32.gmra.mxu1 %v240_v61 }
  0xef   :  { %v243_v2 = vmax.f32 %v230_v0, 0.0  ;;  %v234_v5 = vadd.f32 %v233_v1, %v142_v47 }
  0xf0   :  { %v235_v6 = vpop.f32.mrf.mxu0 }
  0xf1   :  { %v236_v7 = vadd.f32 %v235_v6, %v146_v48  ;;  %493 = vmatprep.mubr.msk.f32.mxu1 %vm257_vm0, %v243_v2  ;;  %v244_v9 = vmax.f32 %v234_v5, 0.0 }
  0xf2   :  { %347 = vmatmul.mubr.f32.gmra.mxu1 %v242_v3 }
  0xf3   :  { %v245_v8 = vmax.f32 %v236_v7, 0.0 }
  0xf5   :  { %494 = vmatprep.mubr.msk.f32.mxu1 %vm257_vm0, %v245_v8 }
  0xf6   :  { %353 = vmatmul.mubr.f32.gmra.mxu1 %v244_v9 }
 0x1aa   :  { %v336_v17 = vpop.f32.mrf.mxu1 }
 0x1ab   :  { %v337_v18 = vadd.f32 %v336_v17, %v250_v15 }
 0x1ac   :  { %v338_v19 = vpop.f32.mrf.mxu1 }
 0x1ad   :  { %v339_v20 = vadd.f32 %v338_v19, %v254_v16  ;;  %v359_v23 = vmax.f32 %v337_v18, 0.0 }
 0x1ae   :  { %v342_v21 = vpop.f32.mrf.mxu1 }
 0x1af   :  { %v360_v22 = vmax.f32 %v339_v20, 0.0  ;;  %v343_v24 = vadd.f32 %v342_v21, %v250_v15 }
 0x1b0   :  { %v344_v4 = vpop.f32.mrf.mxu1 }
 0x1b1   :  { %v345_v25 = vadd.f32 %v344_v4, %v254_v16  ;;  %496 = vmatprep.mubr.msk.f32.mxu0 %vm257_vm0, %v360_v22  ;;  %v361_v28 = vmax.f32 %v343_v24, 0.0 }
 0x1b2   :  { %v348_v26 = vpop.f32.mrf.mxu1  ;;  %450 = vmatmul.mubr.f32.vlgmr.msra.gmra.mxu0 %v359_v23 }
 0x1b3   :  { %v362_v27 = vmax.f32 %v345_v25, 0.0  ;;  %v349_v29 = vadd.f32 %v348_v26, %v250_v15 }
 0x1b4   :  { %v350_v30 = vpop.f32.mrf.mxu1 }
 0x1b5   :  { %v351_v31 = vadd.f32 %v350_v30, %v254_v16  ;;  %497 = vmatprep.mubr.msk.f32.mxu0 %vm257_vm0, %v362_v27  ;;  %v363_v34 = vmax.f32 %v349_v29, 0.0 }
 0x1b6   :  { %v354_v32 = vpop.f32.mrf.mxu1  ;;  %455 = vmatmul.mubr.f32.gmra.mxu0 %v361_v28 }
 0x1b7   :  { %v364_v33 = vmax.f32 %v351_v31, 0.0  ;;  %v355_v35 = vadd.f32 %v354_v32, %v250_v15 }
 0x1b8   :  { %v356_v36 = vpop.f32.mrf.mxu1 }
 0x1b9   :  { %v357_v37 = vadd.f32 %v356_v36, %v254_v16  ;;  %498 = vmatprep.mubr.msk.f32.mxu0 %vm257_vm0, %v364_v33  ;;  %v365_v39 = vmax.f32 %v355_v35, 0.0 }
 0x1ba   :  { %460 = vmatmul.mubr.f32.gmra.mxu0 %v363_v34 }
 0x1bb   :  { %v366_v38 = vmax.f32 %v357_v37, 0.0 }
 0x1bd   :  { %499 = vmatprep.mubr.msk.f32.mxu0 %vm257_vm0, %v366_v38 }
 0x1be   :  { %465 = vmatmul.mubr.f32.gmra.mxu0 %v365_v39 }
 0x272   :  { %v451_v41 = vpop.f32.mrf.mxu0 }
 0x273   :  { %v452_v42 = vadd.f32 %v495_v40, %v451_v41 }
 0x274   :  { %v453_v43 = vpop.f32.mrf.mxu0 }
 0x275   :  { %471 = vst.msk [vmem:[#allocation2] sm:$0xff] %vm470_vm1, %v452_v42 }
 0x276   :  { %v456_v44 = vpop.f32.mrf.mxu0 }
 0x277   :  { %v457_v45 = vadd.f32 %v495_v40, %v456_v44 }
 0x278   :  { %v458_v46 = vpop.f32.mrf.mxu0 }
 0x279   :  { %472 = vst.msk [vmem:[#allocation2 + $0x8] sm:$0xff] %vm470_vm1, %v457_v45 }
 0x27a   :  { %v461_v47 = vpop.f32.mrf.mxu0 }
 0x27b   :  { %v462_v48 = vadd.f32 %v495_v40, %v461_v47 }
 0x27c   :  { %v463_v49 = vpop.f32.mrf.mxu0 }
 0x27d   :  { %473 = vst.msk [vmem:[#allocation2 + $0x10] sm:$0xff] %vm470_vm1, %v462_v48 }
 0x27e   :  { %v466_v50 = vpop.f32.mrf.mxu0 }
 0x27f   :  { %v467_v51 = vadd.f32 %v495_v40, %v466_v50 }
 0x280   :  { %v468_v52 = vpop.f32.mrf.mxu0 }
 0x281   :  { %474 = vst.msk [vmem:[#allocation2 + $0x18] sm:$0xff] %vm470_vm1, %v467_v51 }
 0x282   :  { %515 = shalt.err (!%p512_p4)
}
 0x283   :  { %s528_s0 = smov 128   ;;  %s529_s28 = smov 8  }
 0x284   :  { %486 = dma.vmem_to_hbm [thread:$0]  %s481_s27, 512, %s953_s7, [#allocation3], %s528_s0, %s528_s0, %s529_s28  }
 0x285   :  { %524 = dma.done.wait [#allocation3], 512  }
 0x286   :  { %525 = vsyncadd [#allocation3], 4294966784 }
 0x287   :  { %490 = vsyncpa [#allocation3], 1 }

</bundles_post_ra>
